<compile_context>
chip_gen: v7x
topology: tpu7x:2x2x1
jax: 0.10.0
libtpu: 0.0.40
codegen_flags: <defaults>
</compile_context>

<pallas_src>
import functools

import jax
import jax.numpy as jnp
from jax import lax
from jax.experimental import pallas as pl
from jax.experimental.pallas import tpu as pltpu


def gconv_kernel(x_ref, a_ref, emb_w_ref, emb_b_ref, w_ref, b_ref, pooled_ref,
                 *, tb, n, f):
    """Processes TB graphs per grid step; writes a (TB, F) pooled block.

    Ref shapes (per grid step):
      x_ref:     (TB, N, D_in)
      a_ref:     (TB, N, N)
      emb_w_ref: (D_in, F)   emb_b_ref: (1, F)
      w_ref:     (L, F, F)   b_ref:     (L, 1, F)
      pooled_ref:(TB, F)     (disjoint block per grid step)
    """
    d_in = x_ref.shape[-1]

    # Flatten graphs for the dense layers: (TB*N, D_in)
    x = x_ref[...].reshape(tb * n, d_in)

    # Embedding: (TB*N, D_in) @ (D_in, F) + (1, F)
    h = jnp.dot(x, emb_w_ref[...], preferred_element_type=jnp.float32) \
        + emb_b_ref[...]

    A = a_ref[...]                      # (TB, N, N)
    n_layer = w_ref.shape[0]            # static
    for l in range(n_layer):
        # Linear layer l on the flattened rows: one MXU-shaped matmul.
        h = jnp.dot(h, w_ref[l], preferred_element_type=jnp.float32) + b_ref[l]
        # Graph propagation per graph: einsum('bnm,bmf->bnf', A, h) as a single
        # batched dot_general (batch dim = graph, contract A's last dim with
        # h's node dim).
        h3 = h.reshape(tb, n, f)
        h3 = lax.dot_general(
            A, h3,
            dimension_numbers=(((2,), (1,)), ((0,), (0,))),
            preferred_element_type=jnp.float32)
        h3 = jnp.maximum(h3, 0.0)       # ReLU
        h = h3.reshape(tb * n, f)

    # Mean over nodes (PyTorch x.mean(1)) -> lane-dense (TB, F) output slab.
    pooled_ref[...] = jnp.mean(h.reshape(tb, n, f), axis=1)


def _pick_tb(batch, n_nodes):
    """Largest divisor of `batch` with TB*N <= ~256 rows (fills a v6e/v7x MXU pass)."""
    target = max(1, 256 // max(n_nodes, 1))
    tb = min(batch, target)
    while tb > 1 and batch % tb != 0:
        tb -= 1
    return max(tb, 1)


def gconv_regressor(x, A, params, tb=None):
    """Wrapper around pallas_call. x:(B,N,D_in) A:(B,N,N) -> (B,2)."""
    B, N, D_in = x.shape
    emb_w, emb_b, Ws, bs, fc_w, fc_b = params
    F_dim = emb_w.shape[1]
    L = Ws.shape[0]

    if tb is None:
        tb = _pick_tb(B, N)
    assert B % tb == 0, (B, tb)
    grid = (B // tb,)

    # Advisory cost estimate (flops of emb + L graph-conv layers; bytes of all
    # operands + pooled output) so XLA does not treat this tiny call as heavy.
    flops = 2 * B * (N * D_in * F_dim + L * (N * F_dim * F_dim + N * N * F_dim))
    bytes_accessed = 4 * (x.size + A.size + emb_w.size + emb_b.size
                          + Ws.size + bs.size + B * F_dim)

    kernel = functools.partial(gconv_kernel, tb=tb, n=N, f=F_dim)

    pooled = pl.pallas_call(
        kernel,
        out_shape=jax.ShapeDtypeStruct((B, F_dim), jnp.float32),
        grid_spec=pltpu.PrefetchScalarGridSpec(
            num_scalar_prefetch=0,
            grid=grid,
            in_specs=[
                pl.BlockSpec((tb, N, D_in), lambda g: (g, 0, 0)),
                pl.BlockSpec((tb, N, N), lambda g: (g, 0, 0)),
                # Grid-invariant parameters (re-used every step, never re-DMA'd).
                pl.BlockSpec((D_in, F_dim), lambda g: (0, 0)),
                pl.BlockSpec((1, F_dim), lambda g: (0, 0)),
                pl.BlockSpec((L, F_dim, F_dim), lambda g: (0, 0, 0)),
                pl.BlockSpec((L, 1, F_dim), lambda g: (0, 0, 0)),
            ],
            # Disjoint, lane-dense output block per grid step -> plain stores
            # and a "parallel" batch axis (v7x megacore).
            out_specs=pl.BlockSpec((tb, F_dim), lambda g: (g, 0)),
        ),
        compiler_params=pltpu.CompilerParams(
            dimension_semantics=("parallel",)),
        cost_estimate=pl.CostEstimate(
            flops=flops, transcendentals=0, bytes_accessed=bytes_accessed),
    )(x, A, emb_w, emb_b, Ws, bs)

    # Lane-sparse (F, 2) head + bias: trivial work, done in XLA outside the
    # kernel so the kernel never emits a 2-wide masked store.
    return pooled @ fc_w + fc_b


def reference(x, A, params):
    emb_w, emb_b, Ws, bs, fc_w, fc_b = params
    h = jnp.einsum('bnd,df->bnf', x, emb_w) + emb_b[0]
    for l in range(Ws.shape[0]):
        h = jnp.einsum('bnf,fg->bng', h, Ws[l]) + bs[l, 0]
        h = jnp.einsum('bnm,bmf->bnf', A, h)
        h = jax.nn.relu(h)
    pooled = h.mean(axis=1)
    return pooled @ fc_w + fc_b


def init_params(key, d_in, n_feature, n_layer):
    ks = jax.random.split(key, 6)
    emb_w = jax.random.normal(ks[0], (d_in, n_feature), jnp.float32) * 0.1
    emb_b = jax.random.normal(ks[1], (1, n_feature), jnp.float32) * 0.1
    Ws = jax.random.normal(ks[2], (n_layer, n_feature, n_feature), jnp.float32) * 0.1
    bs = jax.random.normal(ks[3], (n_layer, 1, n_feature), jnp.float32) * 0.1
    fc_w = jax.random.normal(ks[4], (n_feature, 2), jnp.float32) * 0.1
    fc_b = jax.random.normal(ks[5], (1, 2), jnp.float32) * 0.1
    return emb_w, emb_b, Ws, bs, fc_w, fc_b


if __name__ == "__main__":
    # D_IN=28 is fixed by the module's embedding layer.  B=16, N=8 gives a
    # flattened 128-row LHS for the dense layers (one full MXU tile on v5e).
    B, N, D_IN = 16, 8, 28
    N_FEATURE, N_LAYER = 32, 3

    key = jax.random.PRNGKey(0)
    kx, ka, kp = jax.random.split(key, 3)

    x = jax.random.normal(kx, (B, N, D_IN), jnp.float32)
    A = jax.random.normal(ka, (B, N, N), jnp.float32)
    params = init_params(kp, D_IN, N_FEATURE, N_LAYER)

    out = gconv_regressor(x, A, params)
    out = jax.block_until_ready(out)

    ref = jax.block_until_ready(reference(x, A, params))
    assert out.shape == (B, 2)
    assert jnp.allclose(out, ref, atol=1e-4, rtol=1e-4), (out, ref)

    print("KERNEL_OK")
</pallas_src>

<mosaic_0001>
module attributes {stable_mosaic.version = 11 : i64} {
  func.func @gconv_kernel(%arg0: i32, %arg1: memref<16x8x28xf32, #tpu.memory_space<vmem>>, %arg2: memref<16x8x8xf32, #tpu.memory_space<vmem>>, %arg3: memref<28x32xf32, #tpu.memory_space<vmem>>, %arg4: memref<1x32xf32, #tpu.memory_space<vmem>>, %arg5: memref<3x32x32xf32, #tpu.memory_space<vmem>>, %arg6: memref<3x1x32xf32, #tpu.memory_space<vmem>>, %arg7: memref<16x32xf32, #tpu.memory_space<vmem>>) attributes {dimension_semantics = [#tpu.dimension_semantics<parallel>], iteration_bounds = array<i64: 1>, scalar_prefetch = 0 : i64, scratch_operands = 0 : i64, tpu.core_type = #tpu.core_type<tc>, window_params = [{transform_indices = @transform_0, window_bounds = array<i64: 16, 8, 28>}, {transform_indices = @transform_1, window_bounds = array<i64: 16, 8, 8>}, {pipeline_mode = #tpu.pipeline_mode<synchronous>, transform_indices = @transform_2, window_bounds = array<i64: 28, 32>}, {pipeline_mode = #tpu.pipeline_mode<synchronous>, transform_indices = @transform_3, window_bounds = array<i64: 1, 32>}, {pipeline_mode = #tpu.pipeline_mode<synchronous>, transform_indices = @transform_4, window_bounds = array<i64: 3, 32, 32>}, {pipeline_mode = #tpu.pipeline_mode<synchronous>, transform_indices = @transform_5, window_bounds = array<i64: 3, 1, 32>}, {transform_indices = @transform_6, window_bounds = array<i64: 16, 32>}]} {
    %c0 = arith.constant 0 : index
    %c0_0 = arith.constant 0 : index
    %c0_1 = arith.constant 0 : index
    %0 = vector.load %arg1[%c0, %c0_0, %c0_1] : memref<16x8x28xf32, #tpu.memory_space<vmem>>, vector<16x8x28xf32>
    %1 = vector.shape_cast %0 : vector<16x8x28xf32> to vector<128x28xf32>
    %c0_2 = arith.constant 0 : index
    %c0_3 = arith.constant 0 : index
    %2 = vector.load %arg3[%c0_2, %c0_3] : memref<28x32xf32, #tpu.memory_space<vmem>>, vector<28x32xf32>
    %cst = arith.constant dense<0.000000e+00> : vector<128x32xf32>
    %3 = tpu.matmul %1, %2, %cst {dimension_numbers = #tpu.dot_dimension_numbers<[1], [0], [0], [1], [0, 0, 1, 1], [], []>} : vector<128x28xf32>, vector<28x32xf32>, vector<128x32xf32> -> vector<128x32xf32>
    %c0_4 = arith.constant 0 : index
    %c0_5 = arith.constant 0 : index
    %4 = vector.load %arg4[%c0_4, %c0_5] : memref<1x32xf32, #tpu.memory_space<vmem>>, vector<1x32xf32>
    %5 = vector.broadcast %4 : vector<1x32xf32> to vector<128x32xf32>
    %6 = arith.addf %3, %5 : vector<128x32xf32>
    %c0_6 = arith.constant 0 : index
    %c0_7 = arith.constant 0 : index
    %c0_8 = arith.constant 0 : index
    %7 = vector.load %arg2[%c0_6, %c0_7, %c0_8] : memref<16x8x8xf32, #tpu.memory_space<vmem>>, vector<16x8x8xf32>
    %c0_9 = arith.constant 0 : index
    %c0_10 = arith.constant 0 : index
    %c0_11 = arith.constant 0 : index
    %8 = vector.load %arg5[%c0_9, %c0_10, %c0_11] : memref<3x32x32xf32, #tpu.memory_space<vmem>>, vector<1x32x32xf32>
    %9 = vector.shape_cast %8 : vector<1x32x32xf32> to vector<32x32xf32>
    %cst_12 = arith.constant dense<0.000000e+00> : vector<128x32xf32>
    %10 = tpu.matmul %6, %9, %cst_12 {dimension_numbers = #tpu.dot_dimension_numbers<[1], [0], [0], [1], [0, 0, 1, 1], [], []>} : vector<128x32xf32>, vector<32x32xf32>, vector<128x32xf32> -> vector<128x32xf32>
    %c0_13 = arith.constant 0 : index
    %c0_14 = arith.constant 0 : index
    %c0_15 = arith.constant 0 : index
    %11 = vector.load %arg6[%c0_13, %c0_14, %c0_15] : memref<3x1x32xf32, #tpu.memory_space<vmem>>, vector<1x1x32xf32>
    %12 = vector.shape_cast %11 : vector<1x1x32xf32> to vector<1x32xf32>
    %13 = vector.broadcast %12 : vector<1x32xf32> to vector<128x32xf32>
    %14 = arith.addf %10, %13 : vector<128x32xf32>
    %15 = vector.shape_cast %14 : vector<128x32xf32> to vector<16x8x32xf32>
    %cst_16 = arith.constant dense<0.000000e+00> : vector<16x8x32xf32>
    %16 = tpu.matmul %7, %15, %cst_16 {dimension_numbers = #tpu.dot_dimension_numbers<[2], [1], [1], [2], [0, 0, 0, 1, 1, 2], [0], [0]>} : vector<16x8x8xf32>, vector<16x8x32xf32>, vector<16x8x32xf32> -> vector<16x8x32xf32>
    %cst_17 = arith.constant 0.000000e+00 : f32
    %17 = vector.broadcast %cst_17 : f32 to vector<16x8x32xf32>
    %18 = arith.maximumf %16, %17 : vector<16x8x32xf32>
    %19 = vector.shape_cast %18 : vector<16x8x32xf32> to vector<128x32xf32>
    %c1 = arith.constant 1 : index
    %c0_18 = arith.constant 0 : index
    %c0_19 = arith.constant 0 : index
    %20 = vector.load %arg5[%c1, %c0_18, %c0_19] : memref<3x32x32xf32, #tpu.memory_space<vmem>>, vector<1x32x32xf32>
    %21 = vector.shape_cast %20 : vector<1x32x32xf32> to vector<32x32xf32>
    %cst_20 = arith.constant dense<0.000000e+00> : vector<128x32xf32>
    %22 = tpu.matmul %19, %21, %cst_20 {dimension_numbers = #tpu.dot_dimension_numbers<[1], [0], [0], [1], [0, 0, 1, 1], [], []>} : vector<128x32xf32>, vector<32x32xf32>, vector<128x32xf32> -> vector<128x32xf32>
    %c1_21 = arith.constant 1 : index
    %c0_22 = arith.constant 0 : index
    %c0_23 = arith.constant 0 : index
    %23 = vector.load %arg6[%c1_21, %c0_22, %c0_23] : memref<3x1x32xf32, #tpu.memory_space<vmem>>, vector<1x1x32xf32>
    %24 = vector.shape_cast %23 : vector<1x1x32xf32> to vector<1x32xf32>
    %25 = vector.broadcast %24 : vector<1x32xf32> to vector<128x32xf32>
    %26 = arith.addf %22, %25 : vector<128x32xf32>
    %27 = vector.shape_cast %26 : vector<128x32xf32> to vector<16x8x32xf32>
    %cst_24 = arith.constant dense<0.000000e+00> : vector<16x8x32xf32>
    %28 = tpu.matmul %7, %27, %cst_24 {dimension_numbers = #tpu.dot_dimension_numbers<[2], [1], [1], [2], [0, 0, 0, 1, 1, 2], [0], [0]>} : vector<16x8x8xf32>, vector<16x8x32xf32>, vector<16x8x32xf32> -> vector<16x8x32xf32>
    %cst_25 = arith.constant 0.000000e+00 : f32
    %29 = vector.broadcast %cst_25 : f32 to vector<16x8x32xf32>
    %30 = arith.maximumf %28, %29 : vector<16x8x32xf32>
    %31 = vector.shape_cast %30 : vector<16x8x32xf32> to vector<128x32xf32>
    %c2 = arith.constant 2 : index
    %c0_26 = arith.constant 0 : index
    %c0_27 = arith.constant 0 : index
    %32 = vector.load %arg5[%c2, %c0_26, %c0_27] : memref<3x32x32xf32, #tpu.memory_space<vmem>>, vector<1x32x32xf32>
    %33 = vector.shape_cast %32 : vector<1x32x32xf32> to vector<32x32xf32>
    %cst_28 = arith.constant dense<0.000000e+00> : vector<128x32xf32>
    %34 = tpu.matmul %31, %33, %cst_28 {dimension_numbers = #tpu.dot_dimension_numbers<[1], [0], [0], [1], [0, 0, 1, 1], [], []>} : vector<128x32xf32>, vector<32x32xf32>, vector<128x32xf32> -> vector<128x32xf32>
    %c2_29 = arith.constant 2 : index
    %c0_30 = arith.constant 0 : index
    %c0_31 = arith.constant 0 : index
    %35 = vector.load %arg6[%c2_29, %c0_30, %c0_31] : memref<3x1x32xf32, #tpu.memory_space<vmem>>, vector<1x1x32xf32>
    %36 = vector.shape_cast %35 : vector<1x1x32xf32> to vector<1x32xf32>
    %37 = vector.broadcast %36 : vector<1x32xf32> to vector<128x32xf32>
    %38 = arith.addf %34, %37 : vector<128x32xf32>
    %39 = vector.shape_cast %38 : vector<128x32xf32> to vector<16x8x32xf32>
    %cst_32 = arith.constant dense<0.000000e+00> : vector<16x8x32xf32>
    %40 = tpu.matmul %7, %39, %cst_32 {dimension_numbers = #tpu.dot_dimension_numbers<[2], [1], [1], [2], [0, 0, 0, 1, 1, 2], [0], [0]>} : vector<16x8x8xf32>, vector<16x8x32xf32>, vector<16x8x32xf32> -> vector<16x8x32xf32>
    %cst_33 = arith.constant 0.000000e+00 : f32
    %41 = vector.broadcast %cst_33 : f32 to vector<16x8x32xf32>
    %42 = arith.maximumf %40, %41 : vector<16x8x32xf32>
    %43 = vector.shape_cast %42 : vector<16x8x32xf32> to vector<128x32xf32>
    %44 = vector.shape_cast %43 : vector<128x32xf32> to vector<16x8x32xf32>
    %cst_34 = arith.constant dense<0.000000e+00> : vector<16x32xf32>
    %45 = vector.multi_reduction <add>, %44, %cst_34 [1] : vector<16x8x32xf32> to vector<16x32xf32>
    %cst_35 = arith.constant 8.000000e+00 : f32
    %46 = vector.broadcast %cst_35 : f32 to vector<16x32xf32>
    %47 = arith.divf %45, %46 : vector<16x32xf32>
    %c0_36 = arith.constant 0 : index
    %c0_37 = arith.constant 0 : index
    %48 = vector.load %arg7[%c0_36, %c0_37] : memref<16x32xf32, #tpu.memory_space<vmem>>, vector<16x32xf32>
    tpu.vector_store %arg7[%c0_36, %c0_37], %47 {strides = array<i32>} : memref<16x32xf32, #tpu.memory_space<vmem>>, vector<16x32xf32>,
    return
  }
  func.func @transform_0(%arg0: i32) -> (i32, i32, i32) {
    %c0_i32 = arith.constant 0 : i32
    %c0_i32_0 = arith.constant 0 : i32
    %c0_i32_1 = arith.constant 0 : i32
    return %arg0, %c0_i32, %c0_i32_0 : i32, i32, i32
  }
  func.func @transform_1(%arg0: i32) -> (i32, i32, i32) {
    %c0_i32 = arith.constant 0 : i32
    %c0_i32_0 = arith.constant 0 : i32
    %c0_i32_1 = arith.constant 0 : i32
    return %arg0, %c0_i32, %c0_i32_0 : i32, i32, i32
  }
  func.func @transform_2(%arg0: i32) -> (i32, i32) {
    %c0_i32 = arith.constant 0 : i32
    %c0_i32_0 = arith.constant 0 : i32
    %c0_i32_1 = arith.constant 0 : i32
    return %c0_i32, %c0_i32_0 : i32, i32
  }
  func.func @transform_3(%arg0: i32) -> (i32, i32) {
    %c0_i32 = arith.constant 0 : i32
    %c0_i32_0 = arith.constant 0 : i32
    %c0_i32_1 = arith.constant 0 : i32
    return %c0_i32, %c0_i32_0 : i32, i32
  }
  func.func @transform_4(%arg0: i32) -> (i32, i32, i32) {
    %c0_i32 = arith.constant 0 : i32
    %c0_i32_0 = arith.constant 0 : i32
    %c0_i32_1 = arith.constant 0 : i32
    %c0_i32_2 = arith.constant 0 : i32
    return %c0_i32, %c0_i32_0, %c0_i32_1 : i32, i32, i32
  }
  func.func @transform_5(%arg0: i32) -> (i32, i32, i32) {
    %c0_i32 = arith.constant 0 : i32
    %c0_i32_0 = arith.constant 0 : i32
    %c0_i32_1 = arith.constant 0 : i32
    %c0_i32_2 = arith.constant 0 : i32
    return %c0_i32, %c0_i32_0, %c0_i32_1 : i32, i32, i32
  }
  func.func @transform_6(%arg0: i32) -> (i32, i32) {
    %c0_i32 = arith.constant 0 : i32
    %c0_i32_0 = arith.constant 0 : i32
    return %arg0, %c0_i32 : i32, i32
  }
}

</mosaic_0001>

<bundles_post_ra>
// kernel: tpu_custom_call.1
= control target key start
LH: loop header
LB: loop body
LE: loop exit
PB: predicated region body
PF: predicated region fallthrough
CT: control target
= control target key end

     0   :  { %11 = vsyncpa [#allocation3], 0  ;;  %s5906_s0 = inlined_call_operand.vmem [shape: f32[16,8,28], index: 0, kind: input, shape index: {}]   ;;  %s5907_s1 = inlined_call_operand.vmem [shape: f32[16,8,8], index: 1, kind: input, shape index: {}]   ;;  %s5908_s2 = inlined_call_operand.vmem [shape: f32[28,32], index: 2, kind: input, shape index: {}]   ;;  %s5909_s3 = inlined_call_operand.vmem [shape: f32[1,32], index: 3, kind: input, shape index: {}]   ;;  %s5910_s4 = inlined_call_operand.hbm [shape: f32[3,32,32], index: 4, kind: input, shape index: {}]   ;;  %s5911_s5 = inlined_call_operand.vmem [shape: f32[3,1,32], index: 5, kind: input, shape index: {}]   ;;  %s5912_s6 = inlined_call_operand.hbm [shape: f32[16,32], index: 6, kind: output, shape index: {}]  }
   0x1   :  { %12 = vsyncpa [#allocation4], 0  ;;  %s5292_s21 = smov [#allocation2]   ;;  %s5244_s25 = scalar_lea.hbm %s5910_s4, 1536 }
   0x2   :  { %s26_s22 = sshll.u32 %s5292_s21, 4  ;;  %p5245_p0 = scmp.ne.s32.totalorder %s5910_s4, %s5244_s25  ;;  %s27_s22 = int_to_ptr.vmem [resolvable:$true] %s26_s22 }
   0x3   :  { %p5248_p1 = scmp.lt.u32.totalorder %s5244_s25, %s5910_s4 }
   0x5   :  { %p5250_p2 = pnand %p5248_p1, %p5245_p0 }
   0x7   :  { %5253 = shalt.err (!%p5250_p2)
}
   0x8   :  { %s5254_s30 = scalar_lea.vmem %s27_s22, 1536  ;;  %p5259_p4 = scmp.lt.s32.totalorder %s27_s22, %s27_s22 }
   0x9   :  { %p5255_p3 = scmp.ne.s32.totalorder %s27_s22, %s5254_s30  ;;  %p5260_p5 = scmp.lt.s32.totalorder %s5254_s30, %s5254_s30 }
   0xb   :  { %p5261_p6 = por %p5260_p5, %p5259_p4 }
   0xd   :  { %p5262_p7 = pnand %p5261_p6, %p5255_p3 }
   0xf   :  { %5265 = shalt.err (!%p5262_p7)
}
  0x10   :  { %s5293_s7 = smov 128   ;;  %s5294_s8 = smov 8  }
  0x11   :  { %32 = dma.hbm_to_vmem [thread:$0]  %s5910_s4, 1536, %s27_s22, [#allocation3], %s5293_s7, %s5293_s7, %s5294_s8  }
  0x12   :  { %5288 = dma.done.wait [#allocation3], 1536  }
  0x13   :  { %5289 = vsyncadd [#allocation3], 4294965760  ;;  %vm114_vm0 = vcmask 1043456   ;;  %vm65_vm1 = vcmask 228352   ;;  %v54_v0 = vld [vmem:[%s5908_s2] sm:$0xff]  ;;  %v55_v1 = vld [vmem:[%s5908_s2 + $0x8] sm:$0xff] }
  0x14   :  { %v56_v2 = vld [vmem:[%s5908_s2 + $0x10] sm:$0xff]  ;;  %v5203_v3 = vpack.c.bf16 %v55_v1, %v54_v0  ;;  %v57_v4 = vld [vmem:[%s5908_s2 + $0x18] sm:$0xf]  ;;  %v38_v5 = vld [vmem:[%s5906_s0] sm:$0xff]  ;;  %vm5295_vm2 = vmmov 1   ;;  %vm290_vm4 = vcmask 261120  }
  0x15   :  { %v5207_v6 = vpack.c.bf16 %v57_v4, %v56_v2  ;;  %vm5208_vm3 = vmpackc.low %vm114_vm0, %vm5295_vm2  ;;  %4843 = vmatprep.mubr.msk.f32.mxu0 %vm65_vm1, %v38_v5  ;;  %v279_v7 = vld [vmem:[#allocation2] sm:$0xff]  ;;  %v280_v8 = vld [vmem:[#allocation2 + $0x8] sm:$0xff]  ;;  %v5296_v61 = vmov 0.0   ;;  %vm5297_vm5 = vmmov 0   ;;  %vm484_vm6 = vcmask 64512  }
  0x16   :  { %5204 = vmatprep.subr.bf16.mxu0 %v5203_v3  ;;  %v39_v9 = vld [vmem:[%s5906_s0 + $0x8] sm:$0xff]  ;;  %v5213_v10 = vpack.c.bf16 %v280_v8, %v279_v7  ;;  %v40_v11 = vld [vmem:[%s5906_s0 + $0x10] sm:$0xff]  ;;  %v41_v12 = vld [vmem:[%s5906_s0 + $0x18] sm:$0xff]  ;;  %vm4498_vm7 = vcmask 1041409   ;;  %vm4500_vm8 = vcmask 1042434   ;;  %vm4502_vm9 = vcmask 1043459  }
  0x17   :  { %5206 = vmatpush3.bf16.msra.mxu0 %v5203_v3  ;;  %v42_v13 = vld [vmem:[%s5906_s0 + $0x20] sm:$0xff]  ;;  %v43_v14 = vld [vmem:[%s5906_s0 + $0x28] sm:$0xff]  ;;  %v44_v15 = vld [vmem:[%s5906_s0 + $0x30] sm:$0xff]  ;;  %vm4504_vm10 = vcmask 1044484   ;;  %vm4506_vm11 = vcmask 1045509   ;;  %vm4508_vm12 = vcmask 1046534  }
  0x18   :  { %5209 = vmatprep.subr.msk.bf16.mxu0 %vm5208_vm3, %v5207_v6  ;;  %5214 = vmatprep.subr.bf16.mxu1 %v5213_v10  ;;  %v45_v16 = vld [vmem:[%s5906_s0 + $0x38] sm:$0xff]  ;;  %v46_v17 = vld [vmem:[%s5906_s0 + $0x40] sm:$0xff]  ;;  %v47_v18 = vld [vmem:[%s5906_s0 + $0x48] sm:$0xff]  ;;  %vm4510_vm13 = vcmask 1047559  }
  0x19   :  { %5216 = vmatpush3.bf16.msra.mxu1 %v5213_v10  ;;  %v48_v19 = vld [vmem:[%s5906_s0 + $0x50] sm:$0xff]  ;;  %v49_v20 = vld [vmem:[%s5906_s0 + $0x58] sm:$0xff]  ;;  %v50_v21 = vld [vmem:[%s5906_s0 + $0x60] sm:$0xff] }
  0x1a   :  { %v51_v22 = vld [vmem:[%s5906_s0 + $0x68] sm:$0xff]  ;;  %v52_v23 = vld [vmem:[%s5906_s0 + $0x70] sm:$0xff]  ;;  %v53_v24 = vld [vmem:[%s5906_s0 + $0x78] sm:$0xff] }
  0x1b   :  { %5212 = vmatpush3.bf16.msk.msra.mxu0 %vm5208_vm3, %v5207_v6  ;;  %v281_v25 = vld [vmem:[#allocation2 + $0x10] sm:$0xff]  ;;  %v282_v26 = vld [vmem:[#allocation2 + $0x18] sm:$0xff]  ;;  %v4540_v28 = vld [vmem:[%s5909_s3] ss:$0 sm:$0xff] }
  0x1c   :  { %v5217_v27 = vpack.c.bf16 %v282_v26, %v281_v25  ;;  %4899 = vmatprep.subr.mxu0 %v5296_v61  ;;  %v5453_v62 = vld [vmem:[%s5911_s5] ss:$0 sm:$0xff]  ;;  %v5459_v2 = vld [vmem:[%s5907_s1 + $0x8] sm:$0xff]  ;;  %v5476_v8 = vld [vmem:[%s5907_s1 + $0x18] sm:$0xff] }
  0x1d   :  { %v5465_v4 = vld [vmem:[%s5907_s1] sm:$0xff]  ;;  %v5485_v10 = vld [vmem:[%s5907_s1 + $0x10] sm:$0xff]  ;;  %v5542_v26 = vld [vmem:[%s5907_s1 + $0x48] sm:$0xff] }
  0x1e   :  { %4844 = vmatmul.mubr.msk.f32.vlgmr.msra.gmra.mrb[0].mxu0 %vm65_vm1, %v39_v9  ;;  %5218 = vmatprep.subr.bf16.mxu1 %v5217_v27 }
  0x1f   :  { %4846 = vmatprep.mubr.msk.f32.mxu0 %vm65_vm1, %v40_v11  ;;  %5220 = vmatpush3.bf16.msra.mxu1 %v5217_v27 }
  0x20   :  { %4904 = vmatprep.subr.mxu1 %v5296_v61 }
  0x22   :  { %4847 = vmatmul.mubr.msk.f32.gmra.mrb[2].mxu0 %vm65_vm1, %v41_v12 }
  0x23   :  { %4849 = vmatprep.mubr.msk.f32.mxu0 %vm65_vm1, %v42_v13 }
  0x26   :  { %4850 = vmatmul.mubr.msk.f32.gmra.mrb[4].mxu0 %vm65_vm1, %v43_v14  ;;  %v5498_v14 = vld [vmem:[%s5907_s1 + $0x28] sm:$0xff] }
  0x27   :  { %4852 = vmatprep.mubr.msk.f32.mxu0 %vm65_vm1, %v44_v15 }
  0x2a   :  { %4853 = vmatmul.mubr.msk.f32.gmra.mrb[6].mxu0 %vm65_vm1, %v45_v16  ;;  %v5507_v16 = vld [vmem:[%s5907_s1 + $0x20] sm:$0xff] }
  0x2b   :  { %4855 = vmatprep.mubr.msk.f32.mxu0 %vm65_vm1, %v46_v17 }
  0x2e   :  { %4856 = vmatmul.mubr.msk.f32.gmra.mrb[8].mxu0 %vm65_vm1, %v47_v18 }
  0x2f   :  { %4858 = vmatprep.mubr.msk.f32.mxu0 %vm65_vm1, %v48_v19 }
  0x32   :  { %4859 = vmatmul.mubr.msk.f32.gmra.mrb[10].mxu0 %vm65_vm1, %v49_v20  ;;  %v5520_v20 = vld [vmem:[%s5907_s1 + $0x38] sm:$0xff] }
  0x33   :  { %4861 = vmatprep.mubr.msk.f32.mxu0 %vm65_vm1, %v50_v21 }
  0x36   :  { %4862 = vmatmul.mubr.msk.f32.gmra.mrb[12].mxu0 %vm65_vm1, %v51_v22  ;;  %v5529_v22 = vld [vmem:[%s5907_s1 + $0x30] sm:$0xff] }
  0x37   :  { %4864 = vmatprep.mubr.msk.f32.mxu0 %vm65_vm1, %v52_v23 }
  0x3a   :  { %4865 = vmatmul.mubr.msk.f32.gmra.mrb[14].mxu0 %vm65_vm1, %v53_v24 }
  0x3b   :  { %4901 = vmatprep.mubr.msk.f32.mxu0 %vm5297_vm5, %v5296_v61 }
  0xf1   :  { %v4845_v29 = vpop.f32.mrb[0].mxu0 }
  0xf2   :  { %v184_v30 = vpop.f32.mrb[1].mxu0  ;;  %v190_v32 = vadd.f32 %v4845_v29, %v4540_v28 }
  0xf3   :  { %v185_v31 = vadd.f32 %v4540_v28, %v184_v30 }
  0xf5   :  { %4875 = vmatprep.mubr.msk.f32.mxu1 %vm290_vm4, %v185_v31  ;;  %v4848_v33 = vpop.f32.mrb[2].mxu0 }
  0xf6   :  { %4876 = vmatmul.mubr.msk.f32.vlgmr.msra.gmra.mrb[0].mxu1 %vm290_vm4, %v190_v32  ;;  %v200_v34 = vadd.f32 %v4848_v33, %v4540_v28  ;;  %v194_v35 = vpop.f32.mrb[3].mxu0  ;;  %v5564_v32 = vld [vmem:[%s5907_s1 + $0x58] sm:$0xff] }
  0xf7   :  { %v195_v36 = vadd.f32 %v4540_v28, %v194_v35 }
  0xf9   :  { %4878 = vmatprep.mubr.msk.f32.mxu1 %vm290_vm4, %v195_v36  ;;  %v4851_v37 = vpop.f32.mrb[4].mxu0 }
  0xfa   :  { %4879 = vmatmul.mubr.msk.f32.gmra.mrb[2].mxu1 %vm290_vm4, %v200_v34  ;;  %v210_v38 = vadd.f32 %v4851_v37, %v4540_v28  ;;  %v204_v39 = vpop.f32.mrb[5].mxu0  ;;  %v5573_v34 = vld [vmem:[%s5907_s1 + $0x50] sm:$0xff] }
  0xfb   :  { %v205_v40 = vadd.f32 %v4540_v28, %v204_v39 }
  0xfd   :  { %4881 = vmatprep.mubr.msk.f32.mxu1 %vm290_vm4, %v205_v40  ;;  %v4854_v41 = vpop.f32.mrb[6].mxu0  ;;  %v5595_v40 = vld [vmem:[%s5907_s1 + $0x60] sm:$0xff] }
  0xfe   :  { %4882 = vmatmul.mubr.msk.f32.gmra.mrb[4].mxu1 %vm290_vm4, %v210_v38  ;;  %v220_v42 = vadd.f32 %v4854_v41, %v4540_v28  ;;  %v214_v43 = vpop.f32.mrb[7].mxu0  ;;  %v5586_v38 = vld [vmem:[%s5907_s1 + $0x68] sm:$0xff]  ;;  %v1670_v41 = vld [vmem:[#allocation2 + $0x20] sm:$0xff] }
  0xff   :  { %v215_v44 = vadd.f32 %v4540_v28, %v214_v43 }
 0x101   :  { %4884 = vmatprep.mubr.msk.f32.mxu1 %vm290_vm4, %v215_v44  ;;  %v4857_v45 = vpop.f32.mrb[8].mxu0 }
 0x102   :  { %4885 = vmatmul.mubr.msk.f32.gmra.mrb[6].mxu1 %vm290_vm4, %v220_v42  ;;  %v230_v46 = vadd.f32 %v4857_v45, %v4540_v28  ;;  %v224_v47 = vpop.f32.mrb[9].mxu0  ;;  %v1671_v42 = vld [vmem:[#allocation2 + $0x28] sm:$0xff] }
 0x103   :  { %v225_v48 = vadd.f32 %v4540_v28, %v224_v47  ;;  %v5221_v47 = vpack.c.bf16 %v1671_v42, %v1670_v41 }
 0x105   :  { %4887 = vmatprep.mubr.msk.f32.mxu1 %vm290_vm4, %v225_v48  ;;  %v4860_v49 = vpop.f32.mrb[10].mxu0 }
 0x106   :  { %4888 = vmatmul.mubr.msk.f32.gmra.mrb[8].mxu1 %vm290_vm4, %v230_v46  ;;  %v240_v50 = vadd.f32 %v4860_v49, %v4540_v28  ;;  %v234_v51 = vpop.f32.mrb[11].mxu0  ;;  %v5608_v46 = vld [vmem:[%s5907_s1 + $0x78] sm:$0xff]  ;;  %v5617_v49 = vld [vmem:[%s5907_s1 + $0x70] sm:$0xff] }
 0x107   :  { %v235_v52 = vadd.f32 %v4540_v28, %v234_v51  ;;  %v1673_v51 = vld [vmem:[#allocation2 + $0x38] sm:$0xff] }
 0x109   :  { %v4863_v53 = vpop.f32.mrb[12].mxu0  ;;  %4890 = vmatprep.mubr.msk.f32.mxu1 %vm290_vm4, %v235_v52 }
 0x10a   :  { %v250_v54 = vadd.f32 %v4863_v53, %v4540_v28  ;;  %v244_v55 = vpop.f32.mrb[13].mxu0  ;;  %4891 = vmatmul.mubr.msk.f32.gmra.mrb[10].mxu1 %vm290_vm4, %v240_v50  ;;  %v1672_v50 = vld [vmem:[#allocation2 + $0x30] sm:$0xff] }
 0x10b   :  { %v245_v56 = vadd.f32 %v4540_v28, %v244_v55  ;;  %v5225_v52 = vpack.c.bf16 %v1673_v51, %v1672_v50 }
 0x10d   :  { %v4866_v57 = vpop.f32.mrb[14].mxu0  ;;  %4893 = vmatprep.mubr.msk.f32.mxu1 %vm290_vm4, %v245_v56 }
 0x10e   :  { %v260_v58 = vadd.f32 %v4866_v57, %v4540_v28  ;;  %v254_v59 = vpop.f32.mrb[15].mxu0  ;;  %4894 = vmatmul.mubr.msk.f32.gmra.mrb[12].mxu1 %vm290_vm4, %v250_v54 }
 0x10f   :  { %v255_v60 = vadd.f32 %v4540_v28, %v254_v59  ;;  %v5551_v28 = vld [vmem:[%s5907_s1 + $0x40] sm:$0xff] }
 0x111   :  { %4896 = vmatprep.mubr.msk.f32.mxu1 %vm290_vm4, %v255_v60 }
 0x112   :  { %4897 = vmatmul.mubr.msk.f32.gmra.mrb[14].mxu1 %vm290_vm4, %v260_v58 }
 0x113   :  { %4906 = vmatprep.mubr.msk.f32.mxu1 %vm5297_vm5, %v5296_v61 }
 0x1c9   :  { %v4877_v63 = vpop.f32.mrb[0].mxu1 }
 0x1ca   :  { %v411_v0 = vadd.f32 %v4877_v63, %v5453_v62  ;;  %v405_v1 = vpop.f32.mrb[1].mxu1 }
 0x1cb   :  { %v406_v3 = vadd.f32 %v5453_v62, %v405_v1 }
 0x1cc   :  { %4905 = vmatpush3.msra.mxu1 %v411_v0 }
 0x1cd   :  { %4900 = vmatpush3.msra.mxu0 %v406_v3  ;;  %4907 = vmatmul.mubr.msk.f32.vlgmr.msra.gmra.mrb[16].mxu1 %vm484_vm6, %v5459_v2  ;;  %v4880_v5 = vpop.f32.mrb[2].mxu1 }
 0x1ce   :  { %4902 = vmatmul.mubr.msk.f32.vlgmr.msra.gmra.mrb[16].mxu0 %vm484_vm6, %v5465_v4  ;;  %v421_v6 = vadd.f32 %v4880_v5, %v5453_v62  ;;  %v415_v7 = vpop.f32.mrb[3].mxu1  ;;  %4909 = vmatprep.subr.mxu0 %v5296_v61 }
 0x1cf   :  { %v416_v9 = vadd.f32 %v5453_v62, %v415_v7  ;;  %4914 = vmatprep.subr.mxu1 %v5296_v61  ;;  %4911 = vmatprep.mubr.msk.f32.mxu0 %vm5297_vm5, %v5296_v61 }
 0x1d0   :  { %4915 = vmatpush3.msra.mxu1 %v421_v6  ;;  %4916 = vmatprep.mubr.msk.f32.mxu1 %vm5297_vm5, %v5296_v61 }
 0x1d1   :  { %4910 = vmatpush3.msra.mxu0 %v416_v9  ;;  %4917 = vmatmul.mubr.msk.f32.vlgmr.msra.gmra.mrb[18].mxu1 %vm484_vm6, %v5476_v8  ;;  %v4883_v11 = vpop.f32.mrb[4].mxu1 }
 0x1d2   :  { %4912 = vmatmul.mubr.msk.f32.vlgmr.msra.gmra.mrb[18].mxu0 %vm484_vm6, %v5485_v10  ;;  %v431_v12 = vadd.f32 %v4883_v11, %v5453_v62  ;;  %v425_v13 = vpop.f32.mrb[5].mxu1  ;;  %4919 = vmatprep.subr.mxu0 %v5296_v61 }
 0x1d3   :  { %v426_v15 = vadd.f32 %v5453_v62, %v425_v13  ;;  %4924 = vmatprep.subr.mxu1 %v5296_v61  ;;  %4921 = vmatprep.mubr.msk.f32.mxu0 %vm5297_vm5, %v5296_v61 }
 0x1d4   :  { %4925 = vmatpush3.msra.mxu1 %v431_v12  ;;  %4926 = vmatprep.mubr.msk.f32.mxu1 %vm5297_vm5, %v5296_v61 }
 0x1d5   :  { %4920 = vmatpush3.msra.mxu0 %v426_v15  ;;  %4927 = vmatmul.mubr.msk.f32.vlgmr.msra.gmra.mrb[20].mxu1 %vm484_vm6, %v5498_v14  ;;  %v4886_v17 = vpop.f32.mrb[6].mxu1 }
 0x1d6   :  { %4922 = vmatmul.mubr.msk.f32.vlgmr.msra.gmra.mrb[20].mxu0 %vm484_vm6, %v5507_v16  ;;  %v441_v18 = vadd.f32 %v4886_v17, %v5453_v62  ;;  %v435_v19 = vpop.f32.mrb[7].mxu1  ;;  %4929 = vmatprep.subr.mxu0 %v5296_v61 }
 0x1d7   :  { %v436_v21 = vadd.f32 %v5453_v62, %v435_v19  ;;  %4934 = vmatprep.subr.mxu1 %v5296_v61  ;;  %4931 = vmatprep.mubr.msk.f32.mxu0 %vm5297_vm5, %v5296_v61 }
 0x1d8   :  { %4935 = vmatpush3.msra.mxu1 %v441_v18  ;;  %4936 = vmatprep.mubr.msk.f32.mxu1 %vm5297_vm5, %v5296_v61 }
 0x1d9   :  { %4930 = vmatpush3.msra.mxu0 %v436_v21  ;;  %4937 = vmatmul.mubr.msk.f32.vlgmr.msra.gmra.mrb[22].mxu1 %vm484_vm6, %v5520_v20  ;;  %v4889_v23 = vpop.f32.mrb[8].mxu1 }
 0x1da   :  { %4932 = vmatmul.mubr.msk.f32.vlgmr.msra.gmra.mrb[22].mxu0 %vm484_vm6, %v5529_v22  ;;  %v451_v24 = vadd.f32 %v4889_v23, %v5453_v62  ;;  %v445_v25 = vpop.f32.mrb[9].mxu1  ;;  %4939 = vmatprep.subr.mxu0 %v5296_v61 }
 0x1db   :  { %v446_v27 = vadd.f32 %v5453_v62, %v445_v25  ;;  %4944 = vmatprep.subr.mxu1 %v5296_v61  ;;  %4941 = vmatprep.mubr.msk.f32.mxu0 %vm5297_vm5, %v5296_v61 }
 0x1dc   :  { %4945 = vmatpush3.msra.mxu1 %v451_v24  ;;  %4946 = vmatprep.mubr.msk.f32.mxu1 %vm5297_vm5, %v5296_v61 }
 0x1dd   :  { %4940 = vmatpush3.msra.mxu0 %v446_v27  ;;  %4947 = vmatmul.mubr.msk.f32.vlgmr.msra.gmra.mrb[24].mxu1 %vm484_vm6, %v5542_v26  ;;  %v4892_v29 = vpop.f32.mrb[10].mxu1 }
 0x1de   :  { %4942 = vmatmul.mubr.msk.f32.vlgmr.msra.gmra.mrb[24].mxu0 %vm484_vm6, %v5551_v28  ;;  %v461_v30 = vadd.f32 %v4892_v29, %v5453_v62  ;;  %v455_v31 = vpop.f32.mrb[11].mxu1  ;;  %4949 = vmatprep.subr.mxu0 %v5296_v61 }
 0x1df   :  { %v456_v33 = vadd.f32 %v5453_v62, %v455_v31  ;;  %4951 = vmatprep.mubr.msk.f32.mxu0 %vm5297_vm5, %v5296_v61  ;;  %4954 = vmatprep.subr.mxu1 %v5296_v61 }
 0x1e0   :  { %4955 = vmatpush3.msra.mxu1 %v461_v30  ;;  %4956 = vmatprep.mubr.msk.f32.mxu1 %vm5297_vm5, %v5296_v61 }
 0x1e1   :  { %v4895_v35 = vpop.f32.mrb[12].mxu1  ;;  %4950 = vmatpush3.msra.mxu0 %v456_v33  ;;  %4957 = vmatmul.mubr.msk.f32.vlgmr.msra.gmra.mrb[26].mxu1 %vm484_vm6, %v5564_v32 }
 0x1e2   :  { %v471_v36 = vadd.f32 %v4895_v35, %v5453_v62  ;;  %v465_v37 = vpop.f32.mrb[13].mxu1  ;;  %4952 = vmatmul.mubr.msk.f32.vlgmr.msra.gmra.mrb[26].mxu0 %vm484_vm6, %v5573_v34  ;;  %4959 = vmatprep.subr.mxu0 %v5296_v61 }
 0x1e3   :  { %v466_v39 = vadd.f32 %v5453_v62, %v465_v37  ;;  %4961 = vmatprep.mubr.msk.f32.mxu0 %vm5297_vm5, %v5296_v61  ;;  %4964 = vmatprep.subr.mxu1 %v5296_v61 }
 0x1e4   :  { %4965 = vmatpush3.msra.mxu1 %v471_v36  ;;  %4966 = vmatprep.mubr.msk.f32.mxu1 %vm5297_vm5, %v5296_v61 }
 0x1e5   :  { %v4898_v43 = vpop.f32.mrb[14].mxu1  ;;  %4960 = vmatpush3.msra.mxu0 %v466_v39  ;;  %4967 = vmatmul.mubr.msk.f32.vlgmr.msra.gmra.mrb[28].mxu1 %vm484_vm6, %v5586_v38 }
 0x1e6   :  { %v481_v44 = vadd.f32 %v4898_v43, %v5453_v62  ;;  %v475_v45 = vpop.f32.mrb[15].mxu1  ;;  %4962 = vmatmul.mubr.msk.f32.vlgmr.msra.gmra.mrb[28].mxu0 %vm484_vm6, %v5595_v40  ;;  %4969 = vmatprep.subr.mxu0 %v5296_v61 }
 0x1e7   :  { %v476_v48 = vadd.f32 %v5453_v62, %v475_v45  ;;  %4971 = vmatprep.mubr.msk.f32.mxu0 %vm5297_vm5, %v5296_v61  ;;  %4974 = vmatprep.subr.mxu1 %v5296_v61 }
 0x1e8   :  { %4975 = vmatpush3.msra.mxu1 %v481_v44  ;;  %4976 = vmatprep.mubr.msk.f32.mxu1 %vm5297_vm5, %v5296_v61 }
 0x1e9   :  { %4970 = vmatpush3.msra.mxu0 %v476_v48  ;;  %4977 = vmatmul.mubr.msk.f32.vlgmr.msra.gmra.mrb[30].mxu1 %vm484_vm6, %v5608_v46 }
 0x1ea   :  { %4972 = vmatmul.mubr.msk.f32.vlgmr.msra.gmra.mrb[30].mxu0 %vm484_vm6, %v5617_v49  ;;  %5222 = vmatprep.subr.bf16.mxu0 %v5221_v47 }
 0x1eb   :  { %5224 = vmatpush3.bf16.msra.mxu0 %v5221_v47  ;;  %5011 = vmatprep.subr.mxu1 %v5296_v61 }
 0x1ec   :  { %5013 = vmatprep.mubr.msk.f32.mxu1 %vm5297_vm5, %v5296_v61  ;;  %5226 = vmatprep.subr.bf16.mxu0 %v5225_v52 }
 0x1ef   :  { %5228 = vmatpush3.bf16.msra.mxu0 %v5225_v52 }
 0x1f0   :  { %5056 = vmatprep.subr.mxu0 %v5296_v61 }
 0x2a0   :  { %v627_v53 = vpop.f32.mrb[16].mxu1 }
 0x2a1   :  { %v554_v54 = vpop.f32.mrb[16].mxu0  ;;  %v1654_v55 = vmax.f32 %v627_v53, 0.0  ;;  %v4908_v56 = vpop.f32.mrb[17].mxu1 }
 0x2a2   :  { %v1653_v57 = vmax.f32 %v554_v54, 0.0  ;;  %v4903_v58 = vpop.f32.mrb[17].mxu0  ;;  %v5650_v54 = vld [vmem:[%s5911_s5 + $0x1] ss:$0 sm:$0xff] }
 0x2a4   :  { %4987 = vmatprep.mubr.msk.f32.mxu0 %vm290_vm4, %v1653_v57  ;;  %v773_v59 = vpop.f32.mrb[18].mxu1 }
 0x2a5   :  { %4988 = vmatmul.mubr.msk.f32.vlgmr.msra.gmra.mrb[32].mxu0 %vm290_vm4, %v1654_v55  ;;  %v700_v60 = vpop.f32.mrb[18].mxu0  ;;  %v1656_v62 = vmax.f32 %v773_v59, 0.0  ;;  %v4918_v63 = vpop.f32.mrb[19].mxu1 }
 0x2a6   :  { %v1655_v0 = vmax.f32 %v700_v60, 0.0  ;;  %v4913_v1 = vpop.f32.mrb[19].mxu0 }
 0x2a8   :  { %4990 = vmatprep.mubr.msk.f32.mxu0 %vm290_vm4, %v1655_v0  ;;  %v919_v3 = vpop.f32.mrb[20].mxu1 }
 0x2a9   :  { %4991 = vmatmul.mubr.msk.f32.gmra.mrb[34].mxu0 %vm290_vm4, %v1656_v62  ;;  %v846_v5 = vpop.f32.mrb[20].mxu0  ;;  %v1658_v6 = vmax.f32 %v919_v3, 0.0  ;;  %v4928_v7 = vpop.f32.mrb[21].mxu1 }
 0x2aa   :  { %v1657_v9 = vmax.f32 %v846_v5, 0.0  ;;  %v4923_v11 = vpop.f32.mrb[21].mxu0 }
 0x2ac   :  { %4993 = vmatprep.mubr.msk.f32.mxu0 %vm290_vm4, %v1657_v9  ;;  %v1065_v12 = vpop.f32.mrb[22].mxu1 }
 0x2ad   :  { %4994 = vmatmul.mubr.msk.f32.gmra.mrb[36].mxu0 %vm290_vm4, %v1658_v6  ;;  %v992_v13 = vpop.f32.mrb[22].mxu0  ;;  %v1660_v15 = vmax.f32 %v1065_v12, 0.0  ;;  %v4938_v17 = vpop.f32.mrb[23].mxu1 }
 0x2ae   :  { %v1659_v18 = vmax.f32 %v992_v13, 0.0  ;;  %v4933_v19 = vpop.f32.mrb[23].mxu0 }
 0x2b0   :  { %4996 = vmatprep.mubr.msk.f32.mxu0 %vm290_vm4, %v1659_v18  ;;  %v1211_v21 = vpop.f32.mrb[24].mxu1 }
 0x2b1   :  { %4997 = vmatmul.mubr.msk.f32.gmra.mrb[38].mxu0 %vm290_vm4, %v1660_v15  ;;  %v1138_v23 = vpop.f32.mrb[24].mxu0  ;;  %v1662_v24 = vmax.f32 %v1211_v21, 0.0  ;;  %v4948_v25 = vpop.f32.mrb[25].mxu1 }
 0x2b2   :  { %v1661_v27 = vmax.f32 %v1138_v23, 0.0  ;;  %v4943_v29 = vpop.f32.mrb[25].mxu0 }
 0x2b4   :  { %4999 = vmatprep.mubr.msk.f32.mxu0 %vm290_vm4, %v1661_v27  ;;  %v1357_v30 = vpop.f32.mrb[26].mxu1 }
 0x2b5   :  { %5000 = vmatmul.mubr.msk.f32.gmra.mrb[40].mxu0 %vm290_vm4, %v1662_v24  ;;  %v1284_v31 = vpop.f32.mrb[26].mxu0  ;;  %v1664_v33 = vmax.f32 %v1357_v30, 0.0  ;;  %v4958_v35 = vpop.f32.mrb[27].mxu1 }
 0x2b6   :  { %v1663_v36 = vmax.f32 %v1284_v31, 0.0  ;;  %v4953_v37 = vpop.f32.mrb[27].mxu0  ;;  %v3012_v35 = vld [vmem:[#allocation2 + $0x40] sm:$0xff] }
 0x2b8   :  { %5002 = vmatprep.mubr.msk.f32.mxu0 %vm290_vm4, %v1663_v36  ;;  %v1503_v39 = vpop.f32.mrb[28].mxu1  ;;  %v3013_v36 = vld [vmem:[#allocation2 + $0x48] sm:$0xff] }
 0x2b9   :  { %v1430_v41 = vpop.f32.mrb[28].mxu0  ;;  %5003 = vmatmul.mubr.msk.f32.gmra.mrb[42].mxu0 %vm290_vm4, %v1664_v33  ;;  %v1666_v42 = vmax.f32 %v1503_v39, 0.0  ;;  %v4968_v43 = vpop.f32.mrb[29].mxu1  ;;  %v5229_v39 = vpack.c.bf16 %v3013_v36, %v3012_v35 }
 0x2ba   :  { %v1665_v44 = vmax.f32 %v1430_v41, 0.0  ;;  %v4963_v45 = vpop.f32.mrb[29].mxu0  ;;  %v3014_v41 = vld [vmem:[#allocation2 + $0x50] sm:$0xff] }
 0x2bc   :  { %5005 = vmatprep.mubr.msk.f32.mxu0 %vm290_vm4, %v1665_v44  ;;  %v1649_v47 = vpop.f32.mrb[30].mxu1 }
 0x2bd   :  { %v1576_v48 = vpop.f32.mrb[30].mxu0  ;;  %5006 = vmatmul.mubr.msk.f32.gmra.mrb[44].mxu0 %vm290_vm4, %v1666_v42  ;;  %v1668_v50 = vmax.f32 %v1649_v47, 0.0  ;;  %v4978_v51 = vpop.f32.mrb[31].mxu1  ;;  %v3015_v42 = vld [vmem:[#allocation2 + $0x58] sm:$0xff] }
 0x2be   :  { %v1667_v52 = vmax.f32 %v1576_v48, 0.0  ;;  %v4973_v53 = vpop.f32.mrb[31].mxu0  ;;  %v5233_v43 = vpack.c.bf16 %v3015_v42, %v3014_v41 }
 0x2c0   :  { %5008 = vmatprep.mubr.msk.f32.mxu0 %vm290_vm4, %v1667_v52 }
 0x2c1   :  { %5009 = vmatmul.mubr.msk.f32.gmra.mrb[46].mxu0 %vm290_vm4, %v1668_v50 }
 0x2c2   :  { %5058 = vmatprep.mubr.msk.f32.mxu0 %vm5297_vm5, %v5296_v61 }
 0x378   :  { %v4989_v55 = vpop.f32.mrb[32].mxu0 }
 0x379   :  { %v1796_v56 = vpop.f32.mrb[33].mxu0  ;;  %v1802_v58 = vadd.f32 %v4989_v55, %v5650_v54 }
 0x37a   :  { %v1797_v57 = vadd.f32 %v5650_v54, %v1796_v56 }
 0x37c   :  { %5012 = vmatpush3.msra.mxu1 %v1797_v57  ;;  %v4992_v59 = vpop.f32.mrb[34].mxu0 }
 0x37d   :  { %5014 = vmatmul.mubr.msk.f32.vlgmr.msra.gmra.mrb[32].mxu1 %vm484_vm6, %v5465_v4  ;;  %5016 = vmatprep.subr.mxu1 %v5296_v61  ;;  %v1806_v60 = vpop.f32.mrb[35].mxu0  ;;  %v1812_v1 = vadd.f32 %v4992_v59, %v5650_v54 }
 0x37e   :  { %5017 = vmatpush3.msra.mxu1 %v1802_v58  ;;  %5018 = vmatprep.mubr.msk.f32.mxu1 %vm5297_vm5, %v5296_v61  ;;  %v1807_v62 = vadd.f32 %v5650_v54, %v1806_v60 }
 0x37f   :  { %5021 = vmatprep.subr.mxu1 %v5296_v61 }
 0x380   :  { %v4995_v63 = vpop.f32.mrb[36].mxu0 }
 0x381   :  { %5019 = vmatmul.mubr.msk.f32.vlgmr.msra.gmra.mrb[34].mxu1 %vm484_vm6, %v5459_v2  ;;  %v1816_v0 = vpop.f32.mrb[37].mxu0  ;;  %v1822_v12 = vadd.f32 %v4995_v63, %v5650_v54 }
 0x382   :  { %5022 = vmatpush3.msra.mxu1 %v1807_v62  ;;  %5023 = vmatprep.mubr.msk.f32.mxu1 %vm5297_vm5, %v5296_v61  ;;  %v1817_v6 = vadd.f32 %v5650_v54, %v1816_v0 }
 0x383   :  { %5026 = vmatprep.subr.mxu1 %v5296_v61 }
 0x384   :  { %v4998_v3 = vpop.f32.mrb[38].mxu0 }
 0x385   :  { %5024 = vmatmul.mubr.msk.f32.vlgmr.msra.gmra.mrb[36].mxu1 %vm484_vm6, %v5485_v10  ;;  %v1826_v5 = vpop.f32.mrb[39].mxu0  ;;  %v1832_v24 = vadd.f32 %v4998_v3, %v5650_v54 }
 0x386   :  { %5027 = vmatpush3.msra.mxu1 %v1812_v1  ;;  %5028 = vmatprep.mubr.msk.f32.mxu1 %vm5297_vm5, %v5296_v61  ;;  %v1827_v18 = vadd.f32 %v5650_v54, %v1826_v5 }
 0x387   :  { %5031 = vmatprep.subr.mxu1 %v5296_v61 }
 0x388   :  { %v5001_v7 = vpop.f32.mrb[40].mxu0 }
 0x389   :  { %5029 = vmatmul.mubr.msk.f32.vlgmr.msra.gmra.mrb[38].mxu1 %vm484_vm6, %v5476_v8  ;;  %v1842_v9 = vadd.f32 %v5001_v7, %v5650_v54  ;;  %v1836_v11 = vpop.f32.mrb[41].mxu0 }
 0x38a   :  { %5032 = vmatpush3.msra.mxu1 %v1817_v6  ;;  %5033 = vmatprep.mubr.msk.f32.mxu1 %vm5297_vm5, %v5296_v61  ;;  %v1837_v30 = vadd.f32 %v5650_v54, %v1836_v11 }
 0x38b   :  { %5036 = vmatprep.subr.mxu1 %v5296_v61  ;;  %5057 = vmatpush3.msra.mxu0 %v1842_v9 }
 0x38c   :  { %5059 = vmatmul.mubr.msk.f32.vlgmr.msra.gmra.mrb[48].mxu0 %vm484_vm6, %v5542_v26  ;;  %v5004_v13 = vpop.f32.mrb[42].mxu0  ;;  %5066 = vmatprep.subr.mxu0 %v5296_v61 }
 0x38d   :  { %5034 = vmatmul.mubr.msk.f32.vlgmr.msra.gmra.mrb[40].mxu1 %vm484_vm6, %v5507_v16  ;;  %v1852_v15 = vadd.f32 %v5004_v13, %v5650_v54  ;;  %v1846_v17 = vpop.f32.mrb[43].mxu0  ;;  %5068 = vmatprep.mubr.msk.f32.mxu0 %vm5297_vm5, %v5296_v61 }
 0x38e   :  { %5037 = vmatpush3.msra.mxu1 %v1822_v12  ;;  %5038 = vmatprep.mubr.msk.f32.mxu1 %vm5297_vm5, %v5296_v61  ;;  %v1847_v31 = vadd.f32 %v5650_v54, %v1846_v17 }
 0x38f   :  { %5041 = vmatprep.subr.mxu1 %v5296_v61  ;;  %5067 = vmatpush3.msra.mxu0 %v1852_v15 }
 0x390   :  { %v5007_v19 = vpop.f32.mrb[44].mxu0  ;;  %5069 = vmatmul.mubr.msk.f32.vlgmr.msra.gmra.mrb[50].mxu0 %vm484_vm6, %v5564_v32  ;;  %5076 = vmatprep.subr.mxu0 %v5296_v61 }
 0x391   :  { %5039 = vmatmul.mubr.msk.f32.vlgmr.msra.gmra.mrb[42].mxu1 %vm484_vm6, %v5498_v14  ;;  %v1862_v21 = vadd.f32 %v5007_v19, %v5650_v54  ;;  %v1856_v23 = vpop.f32.mrb[45].mxu0  ;;  %5078 = vmatprep.mubr.msk.f32.mxu0 %vm5297_vm5, %v5296_v61 }
 0x392   :  { %5042 = vmatpush3.msra.mxu1 %v1827_v18  ;;  %5043 = vmatprep.mubr.msk.f32.mxu1 %vm5297_vm5, %v5296_v61  ;;  %v1857_v33 = vadd.f32 %v5650_v54, %v1856_v23 }
 0x393   :  { %5046 = vmatprep.subr.mxu1 %v5296_v61  ;;  %5077 = vmatpush3.msra.mxu0 %v1862_v21 }
 0x394   :  { %v5010_v25 = vpop.f32.mrb[46].mxu0  ;;  %5079 = vmatmul.mubr.msk.f32.vlgmr.msra.gmra.mrb[52].mxu0 %vm484_vm6, %v5586_v38  ;;  %5086 = vmatprep.subr.mxu0 %v5296_v61 }
 0x395   :  { %5044 = vmatmul.mubr.msk.f32.vlgmr.msra.gmra.mrb[44].mxu1 %vm484_vm6, %v5529_v22  ;;  %v1872_v27 = vadd.f32 %v5010_v25, %v5650_v54  ;;  %v1866_v29 = vpop.f32.mrb[47].mxu0  ;;  %5088 = vmatprep.mubr.msk.f32.mxu0 %vm5297_vm5, %v5296_v61 }
 0x396   :  { %5047 = vmatpush3.msra.mxu1 %v1832_v24  ;;  %5048 = vmatprep.mubr.msk.f32.mxu1 %vm5297_vm5, %v5296_v61  ;;  %v1867_v37 = vadd.f32 %v5650_v54, %v1866_v29 }
 0x397   :  { %5051 = vmatprep.subr.mxu1 %v5296_v61  ;;  %5087 = vmatpush3.msra.mxu0 %v1872_v27 }
 0x398   :  { %5089 = vmatmul.mubr.msk.f32.vlgmr.msra.gmra.mrb[54].mxu0 %vm484_vm6, %v5608_v46  ;;  %5123 = vmatprep.subr.mxu0 %v5296_v61 }
 0x399   :  { %5049 = vmatmul.mubr.msk.f32.vlgmr.msra.gmra.mrb[46].mxu1 %vm484_vm6, %v5520_v20  ;;  %5125 = vmatprep.mubr.msk.f32.mxu0 %vm5297_vm5, %v5296_v61 }
 0x39a   :  { %5052 = vmatpush3.msra.mxu1 %v1837_v30  ;;  %5053 = vmatprep.mubr.msk.f32.mxu1 %vm5297_vm5, %v5296_v61 }
 0x39b   :  { %5061 = vmatprep.subr.mxu1 %v5296_v61 }
 0x39d   :  { %5054 = vmatmul.mubr.msk.f32.vlgmr.msra.gmra.mrb[48].mxu1 %vm484_vm6, %v5551_v28 }
 0x39e   :  { %5062 = vmatpush3.msra.mxu1 %v1847_v31  ;;  %5063 = vmatprep.mubr.msk.f32.mxu1 %vm5297_vm5, %v5296_v61 }
 0x39f   :  { %5071 = vmatprep.subr.mxu1 %v5296_v61 }
 0x3a1   :  { %5064 = vmatmul.mubr.msk.f32.vlgmr.msra.gmra.mrb[50].mxu1 %vm484_vm6, %v5573_v34 }
 0x3a2   :  { %5072 = vmatpush3.msra.mxu1 %v1857_v33  ;;  %5073 = vmatprep.mubr.msk.f32.mxu1 %vm5297_vm5, %v5296_v61 }
 0x3a3   :  { %5081 = vmatprep.subr.mxu1 %v5296_v61 }
 0x3a5   :  { %5074 = vmatmul.mubr.msk.f32.vlgmr.msra.gmra.mrb[52].mxu1 %vm484_vm6, %v5595_v40 }
 0x3a6   :  { %5082 = vmatpush3.msra.mxu1 %v1867_v37  ;;  %5083 = vmatprep.mubr.msk.f32.mxu1 %vm5297_vm5, %v5296_v61 }
 0x3a7   :  { %5230 = vmatprep.subr.bf16.mxu1 %v5229_v39 }
 0x3a9   :  { %5084 = vmatmul.mubr.msk.f32.vlgmr.msra.gmra.mrb[54].mxu1 %vm484_vm6, %v5617_v49 }
 0x3aa   :  { %5232 = vmatpush3.bf16.msra.mxu1 %v5229_v39 }
 0x3ab   :  { %5234 = vmatprep.subr.bf16.mxu1 %v5233_v43 }
 0x3ae   :  { %5236 = vmatpush3.bf16.msra.mxu1 %v5233_v43 }
 0x3af   :  { %5168 = vmatprep.subr.mxu1 %v5296_v61 }
 0x450   :  { %v1941_v44 = vpop.f32.mrb[32].mxu1 }
 0x451   :  { %v2995_v45 = vmax.f32 %v1941_v44, 0.0  ;;  %v5015_v47 = vpop.f32.mrb[33].mxu1 }
 0x453   :  { %5099 = vmatprep.mubr.msk.f32.mxu1 %vm290_vm4, %v2995_v45  ;;  %v5767_v45 = vld [vmem:[%s5911_s5 + $0x2] ss:$0 sm:$0xff]  ;;  %s5298_s5 = smov [#allocation5]  }
 0x454   :  { %v2011_v48 = vpop.f32.mrb[34].mxu1  ;;  %s4528_s14 = sshll.u32 %s5298_s5, 4  ;;  %s4529_s14 = int_to_ptr.vmem [resolvable:$true] %s4528_s14 }
 0x455   :  { %v2996_v50 = vmax.f32 %v2011_v48, 0.0  ;;  %v5020_v51 = vpop.f32.mrb[35].mxu1  ;;  %s5266_s15 = scalar_lea.vmem %s4529_s14, 256  ;;  %p5271_p9 = scmp.lt.s32.totalorder %s4529_s14, %s4529_s14 }
 0x456   :  { %p5267_p8 = scmp.ne.s32.totalorder %s4529_s14, %s5266_s15  ;;  %p5272_p10 = scmp.lt.s32.totalorder %s5266_s15, %s5266_s15 }
 0x457   :  { %5100 = vmatmul.mubr.msk.f32.vlgmr.msra.gmra.mrb[56].mxu1 %vm290_vm4, %v2996_v50 }
 0x458   :  { %v2081_v52 = vpop.f32.mrb[36].mxu1  ;;  %p5273_p11 = por %p5272_p10, %p5271_p9 }
 0x459   :  { %v2997_v53 = vmax.f32 %v2081_v52, 0.0  ;;  %v5025_v54 = vpop.f32.mrb[37].mxu1 }
 0x45a   :  { %p5274_p12 = pnand %p5273_p11, %p5267_p8 }
 0x45b   :  { %5102 = vmatprep.mubr.msk.f32.mxu1 %vm290_vm4, %v2997_v53 }
 0x45c   :  { %v2151_v55 = vpop.f32.mrb[38].mxu1 }
 0x45d   :  { %v2998_v56 = vmax.f32 %v2151_v55, 0.0  ;;  %v5030_v57 = vpop.f32.mrb[39].mxu1 }
 0x45f   :  { %5103 = vmatmul.mubr.msk.f32.gmra.mrb[58].mxu1 %vm290_vm4, %v2998_v56  ;;  %v2571_v58 = vpop.f32.mrb[48].mxu0 }
 0x460   :  { %v2221_v59 = vpop.f32.mrb[40].mxu1  ;;  %v5060_v60 = vpop.f32.mrb[49].mxu0  ;;  %v3004_v24 = vmax.f32 %v2571_v58, 0.0 }
 0x461   :  { %v2999_v62 = vmax.f32 %v2221_v59, 0.0  ;;  %v5035_v63 = vpop.f32.mrb[41].mxu1 }
 0x463   :  { %5105 = vmatprep.mubr.msk.f32.mxu1 %vm290_vm4, %v2999_v62  ;;  %v2711_v0 = vpop.f32.mrb[50].mxu0 }
 0x464   :  { %v2291_v1 = vpop.f32.mrb[42].mxu1  ;;  %v5070_v3 = vpop.f32.mrb[51].mxu0  ;;  %v3006_v30 = vmax.f32 %v2711_v0, 0.0 }
 0x465   :  { %v3000_v5 = vmax.f32 %v2291_v1, 0.0  ;;  %v5040_v6 = vpop.f32.mrb[43].mxu1 }
 0x467   :  { %5106 = vmatmul.mubr.msk.f32.gmra.mrb[60].mxu1 %vm290_vm4, %v3000_v5  ;;  %v2851_v7 = vpop.f32.mrb[52].mxu0 }
 0x468   :  { %v2361_v9 = vpop.f32.mrb[44].mxu1  ;;  %v5080_v11 = vpop.f32.mrb[53].mxu0  ;;  %v3008_v36 = vmax.f32 %v2851_v7, 0.0 }
 0x469   :  { %v3001_v12 = vmax.f32 %v2361_v9, 0.0  ;;  %v5045_v13 = vpop.f32.mrb[45].mxu1 }
 0x46b   :  { %5108 = vmatprep.mubr.msk.f32.mxu1 %vm290_vm4, %v3001_v12  ;;  %v2991_v15 = vpop.f32.mrb[54].mxu0 }
 0x46c   :  { %v2431_v17 = vpop.f32.mrb[46].mxu1  ;;  %v5090_v18 = vpop.f32.mrb[55].mxu0  ;;  %v3010_v42 = vmax.f32 %v2991_v15, 0.0 }
 0x46d   :  { %v3002_v19 = vmax.f32 %v2431_v17, 0.0  ;;  %v5050_v21 = vpop.f32.mrb[47].mxu1 }
 0x46f   :  { %5109 = vmatmul.mubr.msk.f32.gmra.mrb[62].mxu1 %vm290_vm4, %v3002_v19 }
 0x470   :  { %v2501_v23 = vpop.f32.mrb[48].mxu1 }
 0x471   :  { %v3003_v25 = vmax.f32 %v2501_v23, 0.0  ;;  %v5055_v27 = vpop.f32.mrb[49].mxu1 }
 0x473   :  { %5111 = vmatprep.mubr.msk.f32.mxu1 %vm290_vm4, %v3003_v25 }
 0x474   :  { %5112 = vmatmul.mubr.msk.f32.gmra.mrb[64].mxu1 %vm290_vm4, %v3004_v24  ;;  %v2641_v29 = vpop.f32.mrb[50].mxu1 }
 0x475   :  { %v3005_v31 = vmax.f32 %v2641_v29, 0.0  ;;  %v5065_v33 = vpop.f32.mrb[51].mxu1 }
 0x477   :  { %5114 = vmatprep.mubr.msk.f32.mxu1 %vm290_vm4, %v3005_v31 }
 0x478   :  { %v2781_v35 = vpop.f32.mrb[52].mxu1  ;;  %5115 = vmatmul.mubr.msk.f32.gmra.mrb[66].mxu1 %vm290_vm4, %v3006_v30 }
 0x479   :  { %v3007_v37 = vmax.f32 %v2781_v35, 0.0  ;;  %v5075_v39 = vpop.f32.mrb[53].mxu1 }
 0x47b   :  { %5117 = vmatprep.mubr.msk.f32.mxu1 %vm290_vm4, %v3007_v37 }
 0x47c   :  { %v2921_v41 = vpop.f32.mrb[54].mxu1  ;;  %5118 = vmatmul.mubr.msk.f32.gmra.mrb[68].mxu1 %vm290_vm4, %v3008_v36 }
 0x47d   :  { %v3009_v43 = vmax.f32 %v2921_v41, 0.0  ;;  %v5085_v44 = vpop.f32.mrb[55].mxu1 }
 0x47f   :  { %5120 = vmatprep.mubr.msk.f32.mxu1 %vm290_vm4, %v3009_v43 }
 0x480   :  { %5121 = vmatmul.mubr.msk.f32.gmra.mrb[70].mxu1 %vm290_vm4, %v3010_v42 }
 0x481   :  { %5170 = vmatprep.mubr.msk.f32.mxu1 %vm5297_vm5, %v5296_v61 }
 0x52a   :  { %v5101_v47 = vpop.f32.mrb[56].mxu1 }
 0x52b   :  { %v3138_v48 = vpop.f32.mrb[57].mxu1  ;;  %v3144_v51 = vadd.f32 %v5101_v47, %v5767_v45 }
 0x52c   :  { %v3139_v50 = vadd.f32 %v5767_v45, %v3138_v48 }
 0x52e   :  { %5124 = vmatpush3.msra.mxu0 %v3139_v50 }
 0x52f   :  { %5128 = vmatprep.subr.mxu0 %v5296_v61  ;;  %5126 = vmatmul.mubr.msk.f32.vlgmr.msra.gmra.mrb[56].mxu0 %vm484_vm6, %v5465_v4 }
 0x530   :  { %5129 = vmatpush3.msra.mxu0 %v3144_v51  ;;  %5130 = vmatprep.mubr.msk.f32.mxu0 %vm5297_vm5, %v5296_v61 }
 0x531   :  { %5133 = vmatprep.subr.mxu0 %v5296_v61 }
 0x532   :  { %v5104_v52 = vpop.f32.mrb[58].mxu1 }
 0x533   :  { %v3148_v53 = vpop.f32.mrb[59].mxu1  ;;  %5131 = vmatmul.mubr.msk.f32.vlgmr.msra.gmra.mrb[58].mxu0 %vm484_vm6, %v5459_v2  ;;  %v3154_v55 = vadd.f32 %v5104_v52, %v5767_v45 }
 0x534   :  { %v3149_v54 = vadd.f32 %v5767_v45, %v3148_v53  ;;  %5135 = vmatprep.mubr.msk.f32.mxu0 %vm5297_vm5, %v5296_v61 }
 0x536   :  { %5134 = vmatpush3.msra.mxu0 %v3149_v54 }
 0x537   :  { %5138 = vmatprep.subr.mxu0 %v5296_v61  ;;  %5136 = vmatmul.mubr.msk.f32.vlgmr.msra.gmra.mrb[60].mxu0 %vm484_vm6, %v5485_v10 }
 0x538   :  { %5139 = vmatpush3.msra.mxu0 %v3154_v55  ;;  %5140 = vmatprep.mubr.msk.f32.mxu0 %vm5297_vm5, %v5296_v61 }
 0x539   :  { %5143 = vmatprep.subr.mxu0 %v5296_v61 }
 0x53a   :  { %v5107_v2 = vpop.f32.mrb[60].mxu1 }
 0x53b   :  { %v3158_v4 = vpop.f32.mrb[61].mxu1  ;;  %5141 = vmatmul.mubr.msk.f32.vlgmr.msra.gmra.mrb[62].mxu0 %vm484_vm6, %v5476_v8  ;;  %v3164_v57 = vadd.f32 %v5107_v2, %v5767_v45 }
 0x53c   :  { %v3159_v56 = vadd.f32 %v5767_v45, %v3158_v4  ;;  %5145 = vmatprep.mubr.msk.f32.mxu0 %vm5297_vm5, %v5296_v61 }
 0x53e   :  { %5144 = vmatpush3.msra.mxu0 %v3159_v56 }
 0x53f   :  { %5148 = vmatprep.subr.mxu0 %v5296_v61  ;;  %5146 = vmatmul.mubr.msk.f32.vlgmr.msra.gmra.mrb[64].mxu0 %vm484_vm6, %v5507_v16 }
 0x540   :  { %5149 = vmatpush3.msra.mxu0 %v3164_v57  ;;  %5150 = vmatprep.mubr.msk.f32.mxu0 %vm5297_vm5, %v5296_v61 }
 0x541   :  { %5153 = vmatprep.subr.mxu0 %v5296_v61 }
 0x542   :  { %v5110_v8 = vpop.f32.mrb[62].mxu1 }
 0x543   :  { %v3168_v10 = vpop.f32.mrb[63].mxu1  ;;  %5151 = vmatmul.mubr.msk.f32.vlgmr.msra.gmra.mrb[66].mxu0 %vm484_vm6, %v5498_v14  ;;  %v3174_v59 = vadd.f32 %v5110_v8, %v5767_v45 }
 0x544   :  { %v3169_v58 = vadd.f32 %v5767_v45, %v3168_v10  ;;  %5155 = vmatprep.mubr.msk.f32.mxu0 %vm5297_vm5, %v5296_v61 }
 0x546   :  { %5154 = vmatpush3.msra.mxu0 %v3169_v58 }
 0x547   :  { %5158 = vmatprep.subr.mxu0 %v5296_v61  ;;  %5156 = vmatmul.mubr.msk.f32.vlgmr.msra.gmra.mrb[68].mxu0 %vm484_vm6, %v5529_v22  ;;  %v5113_v16 = vpop.f32.mrb[64].mxu1 }
 0x548   :  { %5159 = vmatpush3.msra.mxu0 %v3174_v59  ;;  %v3184_v60 = vadd.f32 %v5113_v16, %v5767_v45  ;;  %v3178_v62 = vpop.f32.mrb[65].mxu1  ;;  %5160 = vmatprep.mubr.msk.f32.mxu0 %vm5297_vm5, %v5296_v61 }
 0x549   :  { %v3179_v14 = vadd.f32 %v5767_v45, %v3178_v62  ;;  %5163 = vmatprep.subr.mxu0 %v5296_v61 }
 0x54a   :  { %5169 = vmatpush3.msra.mxu1 %v3184_v60 }
 0x54b   :  { %5161 = vmatmul.mubr.msk.f32.vlgmr.msra.gmra.mrb[70].mxu0 %vm484_vm6, %v5520_v20  ;;  %v5116_v63 = vpop.f32.mrb[66].mxu1  ;;  %5171 = vmatmul.mubr.msk.f32.vlgmr.msra.gmra.mrb[72].mxu1 %vm484_vm6, %v5542_v26 }
 0x54c   :  { %5164 = vmatpush3.msra.mxu0 %v3179_v14  ;;  %v3194_v22 = vadd.f32 %v5116_v63, %v5767_v45  ;;  %5165 = vmatprep.mubr.msk.f32.mxu0 %vm5297_vm5, %v5296_v61  ;;  %v3188_v0 = vpop.f32.mrb[67].mxu1 }
 0x54d   :  { %v3189_v1 = vadd.f32 %v5767_v45, %v3188_v0  ;;  %5173 = vmatprep.subr.mxu0 %v5296_v61  ;;  %5178 = vmatprep.subr.mxu1 %v5296_v61 }
 0x54e   :  { %5179 = vmatpush3.msra.mxu1 %v3194_v22  ;;  %5180 = vmatprep.mubr.msk.f32.mxu1 %vm5297_vm5, %v5296_v61 }
 0x54f   :  { %5166 = vmatmul.mubr.msk.f32.vlgmr.msra.gmra.mrb[72].mxu0 %vm484_vm6, %v5551_v28  ;;  %v5119_v20 = vpop.f32.mrb[68].mxu1  ;;  %5181 = vmatmul.mubr.msk.f32.vlgmr.msra.gmra.mrb[74].mxu1 %vm484_vm6, %v5564_v32 }
 0x550   :  { %v3204_v26 = vadd.f32 %v5119_v20, %v5767_v45  ;;  %5174 = vmatpush3.msra.mxu0 %v3189_v1  ;;  %5175 = vmatprep.mubr.msk.f32.mxu0 %vm5297_vm5, %v5296_v61  ;;  %v3198_v3 = vpop.f32.mrb[69].mxu1 }
 0x551   :  { %v3199_v5 = vadd.f32 %v5767_v45, %v3198_v3  ;;  %5183 = vmatprep.subr.mxu0 %v5296_v61  ;;  %5188 = vmatprep.subr.mxu1 %v5296_v61 }
 0x552   :  { %5189 = vmatpush3.msra.mxu1 %v3204_v26  ;;  %5190 = vmatprep.mubr.msk.f32.mxu1 %vm5297_vm5, %v5296_v61 }
 0x553   :  { %5176 = vmatmul.mubr.msk.f32.vlgmr.msra.gmra.mrb[74].mxu0 %vm484_vm6, %v5573_v34  ;;  %v5122_v28 = vpop.f32.mrb[70].mxu1  ;;  %5191 = vmatmul.mubr.msk.f32.vlgmr.msra.gmra.mrb[76].mxu1 %vm484_vm6, %v5586_v38 }
 0x554   :  { %v3214_v32 = vadd.f32 %v5122_v28, %v5767_v45  ;;  %5184 = vmatpush3.msra.mxu0 %v3199_v5  ;;  %5185 = vmatprep.mubr.msk.f32.mxu0 %vm5297_vm5, %v5296_v61  ;;  %v3208_v6 = vpop.f32.mrb[71].mxu1 }
 0x555   :  { %v3209_v7 = vadd.f32 %v5767_v45, %v3208_v6  ;;  %5193 = vmatprep.subr.mxu0 %v5296_v61  ;;  %5198 = vmatprep.subr.mxu1 %v5296_v61 }
 0x556   :  { %5199 = vmatpush3.msra.mxu1 %v3214_v32  ;;  %5200 = vmatprep.mubr.msk.f32.mxu1 %vm5297_vm5, %v5296_v61 }
 0x557   :  { %5186 = vmatmul.mubr.msk.f32.vlgmr.msra.gmra.mrb[76].mxu0 %vm484_vm6, %v5595_v40  ;;  %5201 = vmatmul.mubr.msk.f32.vlgmr.msra.gmra.mrb[78].mxu1 %vm484_vm6, %v5608_v46 }
 0x558   :  { %5194 = vmatpush3.msra.mxu0 %v3209_v7  ;;  %5195 = vmatprep.mubr.msk.f32.mxu0 %vm5297_vm5, %v5296_v61 }
 0x55b   :  { %5196 = vmatmul.mubr.msk.f32.vlgmr.msra.gmra.mrb[78].mxu0 %vm484_vm6, %v5617_v49 }
 0x602   :  { %v3283_v34 = vpop.f32.mrb[56].mxu0 }
 0x603   :  { %v4337_v38 = vmax.f32 %v3283_v34, 0.0  ;;  %v5127_v9 = vpop.f32.mrb[57].mxu0 }
 0x605   :  { %v4353_v11 = vsel %vm290_vm4, %v4337_v38, 0.0 }
 0x606   :  { %v4354_v12 = vrot.slane %v4353_v11, 4  ;;  %v3353_v13 = vpop.f32.mrb[58].mxu0 }
 0x607   :  { %v4338_v15 = vmax.f32 %v3353_v13, 0.0  ;;  %v5132_v17 = vpop.f32.mrb[59].mxu0 }
 0x608   :  { %v4355_v40 = vadd.f32 %v4354_v12, %v4353_v11 }
 0x609   :  { %v4360_v18 = vsel %vm290_vm4, %v4338_v15, 0.0 }
 0x60a   :  { %v4356_v46 = vrot.slane %v4355_v40, 2  ;;  %v4361_v19 = vrot.slane %v4360_v18, 4  ;;  %v3423_v21 = vpop.f32.mrb[60].mxu0 }
 0x60b   :  { %v4339_v23 = vmax.f32 %v3423_v21, 0.0  ;;  %v5137_v61 = vpop.f32.mrb[61].mxu0 }
 0x60c   :  { %v4357_v24 = vadd.f32 %v4356_v46, %v4355_v40  ;;  %v4362_v25 = vadd.f32 %v4361_v19, %v4360_v18 }
 0x60d   :  { %v4367_v49 = vsel %vm290_vm4, %v4339_v23, 0.0 }
 0x60e   :  { %v4358_v27 = vrot.slane %v4357_v24, 1  ;;  %v4363_v29 = vrot.slane %v4362_v25, 2  ;;  %v4368_v30 = vrot.slane %v4367_v49, 4  ;;  %v3493_v31 = vpop.f32.mrb[62].mxu0 }
 0x60f   :  { %v4340_v33 = vmax.f32 %v3493_v31, 0.0  ;;  %v5142_v35 = vpop.f32.mrb[63].mxu0 }
 0x610   :  { %v4364_v36 = vadd.f32 %v4363_v29, %v4362_v25  ;;  %v4369_v37 = vadd.f32 %v4368_v30, %v4367_v49  ;;  %v4359_v39 = vadd.f32 %v4358_v27, %v4357_v24 }
 0x611   :  { %v4374_v41 = vsel %vm290_vm4, %v4340_v33, 0.0 }
 0x612   :  { %v4365_v42 = vrot.slane %v4364_v36, 1  ;;  %v4370_v43 = vrot.slane %v4369_v37, 2  ;;  %v4375_v44 = vrot.slane %v4374_v41, 4  ;;  %v3563_v45 = vpop.f32.mrb[64].mxu0  ;;  %v4466_v53 = vmul.f32 0.125, %v4359_v39 }
 0x613   :  { %v4341_v47 = vmax.f32 %v3563_v45, 0.0  ;;  %v5147_v48 = vpop.f32.mrb[65].mxu0 }
 0x614   :  { %v4366_v50 = vadd.f32 %v4365_v42, %v4364_v36  ;;  %v4371_v51 = vadd.f32 %v4370_v43, %v4369_v37  ;;  %v4376_v52 = vadd.f32 %v4375_v44, %v4374_v41 }
 0x615   :  { %v4381_v54 = vsel %vm290_vm4, %v4341_v47, 0.0 }
 0x616   :  { %v4467_v55 = vmul.f32 0.125, %v4366_v50  ;;  %v4372_v2 = vrot.slane %v4371_v51, 1  ;;  %v4377_v4 = vrot.slane %v4376_v52, 2  ;;  %v4382_v56 = vrot.slane %v4381_v54, 4  ;;  %v3633_v57 = vpop.f32.mrb[66].mxu0 }
 0x617   :  { %v4342_v8 = vmax.f32 %v3633_v57, 0.0  ;;  %v5152_v10 = vpop.f32.mrb[67].mxu0 }
 0x618   :  { %v4499_v58 = vsel %vm4498_vm7, %v4467_v55, %v4466_v53  ;;  %v4373_v59 = vadd.f32 %v4372_v2, %v4371_v51  ;;  %v4378_v16 = vadd.f32 %v4377_v4, %v4376_v52  ;;  %v4383_v60 = vadd.f32 %v4382_v56, %v4381_v54 }
 0x619   :  { %v4388_v62 = vsel %vm290_vm4, %v4342_v8, 0.0 }
 0x61a   :  { %v4468_v14 = vmul.f32 0.125, %v4373_v59  ;;  %v4379_v63 = vrot.slane %v4378_v16, 1  ;;  %v4384_v22 = vrot.slane %v4383_v60, 2  ;;  %v4389_v0 = vrot.slane %v4388_v62, 4  ;;  %v3703_v1 = vpop.f32.mrb[68].mxu0 }
 0x61b   :  { %v4343_v20 = vmax.f32 %v3703_v1, 0.0  ;;  %v5157_v26 = vpop.f32.mrb[69].mxu0 }
 0x61c   :  { %v4501_v3 = vsel %vm4500_vm8, %v4468_v14, %v4499_v58  ;;  %v4380_v5 = vadd.f32 %v4379_v63, %v4378_v16  ;;  %v4385_v28 = vadd.f32 %v4384_v22, %v4383_v60  ;;  %v4390_v32 = vadd.f32 %v4389_v0, %v4388_v62 }
 0x61d   :  { %v4395_v6 = vsel %vm290_vm4, %v4343_v20, 0.0 }
 0x61e   :  { %v4469_v7 = vmul.f32 0.125, %v4380_v5  ;;  %v4386_v34 = vrot.slane %v4385_v28, 1  ;;  %v4391_v38 = vrot.slane %v4390_v32, 2  ;;  %v4396_v9 = vrot.slane %v4395_v6, 4  ;;  %v3773_v11 = vpop.f32.mrb[70].mxu0  ;;  %v3913_v12 = vpop.f32.mrb[72].mxu1 }
 0x61f   :  { %v4344_v13 = vmax.f32 %v3773_v11, 0.0  ;;  %v5162_v15 = vpop.f32.mrb[71].mxu0  ;;  %v4346_v17 = vmax.f32 %v3913_v12, 0.0  ;;  %v5172_v40 = vpop.f32.mrb[73].mxu1 }
 0x620   :  { %v4503_v18 = vsel %vm4502_vm9, %v4469_v7, %v4501_v3  ;;  %v4387_v46 = vadd.f32 %v4386_v34, %v4385_v28  ;;  %v4392_v19 = vadd.f32 %v4391_v38, %v4390_v32  ;;  %v4397_v21 = vadd.f32 %v4396_v9, %v4395_v6 }
 0x621   :  { %v4402_v23 = vsel %vm290_vm4, %v4344_v13, 0.0  ;;  %v4416_v61 = vsel %vm290_vm4, %v4346_v17, 0.0 }
 0x622   :  { %v4470_v24 = vmul.f32 0.125, %v4387_v46  ;;  %v4393_v25 = vrot.slane %v4392_v19, 1  ;;  %v4398_v49 = vrot.slane %v4397_v21, 2  ;;  %v4403_v27 = vrot.slane %v4402_v23, 4  ;;  %v3843_v29 = vpop.f32.mrb[72].mxu0  ;;  %v4053_v30 = vpop.f32.mrb[74].mxu1 }
 0x623   :  { %v4345_v31 = vmax.f32 %v3843_v29, 0.0  ;;  %v5167_v33 = vpop.f32.mrb[73].mxu0  ;;  %v4417_v35 = vrot.slane %v4416_v61, 4  ;;  %v4348_v36 = vmax.f32 %v4053_v30, 0.0  ;;  %v5182_v37 = vpop.f32.mrb[75].mxu1 }
 0x624   :  { %v4394_v39 = vadd.f32 %v4393_v25, %v4392_v19  ;;  %v4399_v41 = vadd.f32 %v4398_v49, %v4397_v21  ;;  %v4404_v42 = vadd.f32 %v4403_v27, %v4402_v23  ;;  %v4505_v43 = vsel %vm4504_vm10, %v4470_v24, %v4503_v18 }
 0x625   :  { %v4409_v44 = vsel %vm290_vm4, %v4345_v31, 0.0  ;;  %v4418_v45 = vadd.f32 %v4417_v35, %v4416_v61  ;;  %v4430_v47 = vsel %vm290_vm4, %v4348_v36, 0.0 }
 0x626   :  { %v4471_v48 = vmul.f32 0.125, %v4394_v39  ;;  %v4400_v50 = vrot.slane %v4399_v41, 1  ;;  %v4405_v51 = vrot.slane %v4404_v42, 2  ;;  %v4410_v52 = vrot.slane %v4409_v44, 4  ;;  %v3983_v53 = vpop.f32.mrb[74].mxu0  ;;  %v4193_v54 = vpop.f32.mrb[76].mxu1 }
 0x627   :  { %v4419_v55 = vrot.slane %v4418_v45, 2  ;;  %v4347_v2 = vmax.f32 %v3983_v53, 0.0  ;;  %v5177_v4 = vpop.f32.mrb[75].mxu0  ;;  %v4431_v56 = vrot.slane %v4430_v47, 4  ;;  %v4350_v57 = vmax.f32 %v4193_v54, 0.0  ;;  %v5192_v8 = vpop.f32.mrb[77].mxu1 }
 0x628   :  { %v4406_v10 = vadd.f32 %v4405_v51, %v4404_v42  ;;  %v4411_v58 = vadd.f32 %v4410_v52, %v4409_v44  ;;  %v4507_v59 = vsel %vm4506_vm11, %v4471_v48, %v4505_v43  ;;  %v4401_v63 = vadd.f32 %v4400_v50, %v4399_v41 }
 0x629   :  { %v4420_v16 = vadd.f32 %v4419_v55, %v4418_v45  ;;  %v4423_v60 = vsel %vm290_vm4, %v4347_v2, 0.0  ;;  %v4432_v62 = vadd.f32 %v4431_v56, %v4430_v47  ;;  %v4444_v14 = vsel %vm290_vm4, %v4350_v57, 0.0 }
 0x62a   :  { %v4407_v22 = vrot.slane %v4406_v10, 1  ;;  %v4412_v0 = vrot.slane %v4411_v58, 2  ;;  %v4424_v1 = vrot.slane %v4423_v60, 4  ;;  %v4123_v20 = vpop.f32.mrb[76].mxu0  ;;  %v4333_v26 = vpop.f32.mrb[78].mxu1  ;;  %v4445_v6 = vrot.slane %v4444_v14, 4 }
 0x62b   :  { %v4421_v3 = vrot.slane %v4420_v16, 1  ;;  %v4433_v5 = vrot.slane %v4432_v62, 2  ;;  %v4349_v28 = vmax.f32 %v4123_v20, 0.0  ;;  %v5187_v32 = vpop.f32.mrb[77].mxu0  ;;  %v5202_v7 = vpop.f32.mrb[79].mxu1  ;;  %v4352_v11 = vmax.f32 %v4333_v26, 0.0 }
 0x62c   :  { %v4408_v34 = vadd.f32 %v4407_v22, %v4406_v10  ;;  %v4413_v38 = vadd.f32 %v4412_v0, %v4411_v58  ;;  %v4425_v9 = vadd.f32 %v4424_v1, %v4423_v60  ;;  %v4446_v17 = vadd.f32 %v4445_v6, %v4444_v14 }
 0x62d   :  { %v4422_v12 = vadd.f32 %v4421_v3, %v4420_v16  ;;  %v4434_v13 = vadd.f32 %v4433_v5, %v4432_v62  ;;  %v4437_v15 = vsel %vm290_vm4, %v4349_v28, 0.0  ;;  %v4472_v40 = vmul.f32 0.125, %v4401_v63 }
 0x62e   :  { %v4414_v18 = vrot.slane %v4413_v38, 1  ;;  %v4426_v46 = vrot.slane %v4425_v9, 2  ;;  %v4438_v19 = vrot.slane %v4437_v15, 4  ;;  %v4263_v21 = vpop.f32.mrb[78].mxu0  ;;  %v4473_v23 = vmul.f32 0.125, %v4408_v34 }
 0x62f   :  { %v4435_v61 = vrot.slane %v4434_v13, 1  ;;  %v4447_v24 = vrot.slane %v4446_v17, 2  ;;  %v4351_v25 = vmax.f32 %v4263_v21, 0.0  ;;  %v5197_v49 = vpop.f32.mrb[79].mxu0  ;;  %v4458_v31 = vsel %vm290_vm4, %v4352_v11, 0.0 }
 0x630   :  { %v4415_v27 = vadd.f32 %v4414_v18, %v4413_v38  ;;  %v4427_v29 = vadd.f32 %v4426_v46, %v4425_v9  ;;  %v4439_v30 = vadd.f32 %v4438_v19, %v4437_v15  ;;  %v4475_v33 = vmul.f32 0.125, %v4422_v12 }
 0x631   :  { %v4448_v35 = vadd.f32 %v4447_v24, %v4446_v17  ;;  %v4451_v36 = vsel %vm290_vm4, %v4351_v25, 0.0  ;;  %v4459_v37 = vrot.slane %v4458_v31, 4  ;;  %v4436_v44 = vadd.f32 %v4435_v61, %v4434_v13 }
 0x632   :  { %v4474_v39 = vmul.f32 0.125, %v4415_v27  ;;  %v4428_v41 = vrot.slane %v4427_v29, 1  ;;  %v4440_v42 = vrot.slane %v4439_v30, 2  ;;  %v4452_v43 = vrot.slane %v4451_v36, 4 }
 0x633   :  { %v4449_v45 = vrot.slane %v4448_v35, 1  ;;  %v4460_v47 = vadd.f32 %v4459_v37, %v4458_v31  ;;  %v4509_v48 = vsel %vm4508_vm12, %v4472_v40, %v4507_v59  ;;  %v4477_v57 = vmul.f32 0.125, %v4436_v44 }
 0x634   :  { %v4512_v50 = vsel %vm4498_vm7, %v4475_v33, %v4474_v39  ;;  %v4429_v51 = vadd.f32 %v4428_v41, %v4427_v29  ;;  %v4441_v52 = vadd.f32 %v4440_v42, %v4439_v30  ;;  %v4453_v53 = vadd.f32 %v4452_v43, %v4451_v36 }
 0x635   :  { %v4461_v54 = vrot.slane %v4460_v47, 2  ;;  %v4511_v55 = vsel %vm4510_vm13, %v4473_v23, %v4509_v48  ;;  %v4450_v8 = vadd.f32 %v4449_v45, %v4448_v35 }
 0x636   :  { %v4476_v2 = vmul.f32 0.125, %v4429_v51  ;;  %v4442_v4 = vrot.slane %v4441_v52, 1  ;;  %v4454_v56 = vrot.slane %v4453_v53, 2  ;;  %4521 = vst.msk [vmem:[#allocation5] sm:$0xff] %vm290_vm4, %v4511_v55 }
 0x637   :  { %v4462_v10 = vadd.f32 %v4461_v54, %v4460_v47  ;;  %v4479_v22 = vmul.f32 0.125, %v4450_v8 }
 0x638   :  { %v4513_v58 = vsel %vm4500_vm8, %v4476_v2, %v4512_v50  ;;  %v4443_v16 = vadd.f32 %v4442_v4, %v4441_v52  ;;  %v4455_v59 = vadd.f32 %v4454_v56, %v4453_v53 }
 0x639   :  { %v4514_v60 = vsel %vm4502_vm9, %v4477_v57, %v4513_v58  ;;  %v4463_v62 = vrot.slane %v4462_v10, 1 }
 0x63a   :  { %v4478_v14 = vmul.f32 0.125, %v4443_v16  ;;  %v4456_v63 = vrot.slane %v4455_v59, 1 }
 0x63b   :  { %v4464_v0 = vadd.f32 %v4463_v62, %v4462_v10 }
 0x63c   :  { %v4457_v1 = vadd.f32 %v4456_v63, %v4455_v59  ;;  %v4515_v20 = vsel %vm4504_vm10, %v4478_v14, %v4514_v60 }
 0x63d   :  { %v4516_v26 = vsel %vm4506_vm11, %v4479_v22, %v4515_v20  ;;  %v4481_v5 = vmul.f32 0.125, %v4464_v0 }
 0x63e   :  { %v4480_v3 = vmul.f32 0.125, %v4457_v1 }
 0x640   :  { %v4517_v28 = vsel %vm4508_vm12, %v4480_v3, %v4516_v26 }
 0x641   :  { %v4518_v32 = vsel %vm4510_vm13, %v4481_v5, %v4517_v28 }
 0x642   :  { %4522 = vst.msk [vmem:[#allocation5 + $0x8] sm:$0xff] %vm290_vm4, %v4518_v32 }
 0x643   :  { %5277 = shalt.err (!%p5274_p12)
}
 0x644   :  { %s5278_s18 = scalar_lea.hbm %s5912_s6, 256 }
 0x645   :  { %p5279_p13 = scmp.ne.s32.totalorder %s5912_s6, %s5278_s18  ;;  %p5282_p0 = scmp.lt.u32.totalorder %s5278_s18, %s5912_s6 }
 0x647   :  { %p5284_p1 = pnand %p5282_p0, %p5279_p13 }
 0x649   :  { %5287 = shalt.err (!%p5284_p1)
}
 0x64a   :  { %4534 = dma.vmem_to_hbm [thread:$0]  %s4529_s14, 256, %s5912_s6, [#allocation4], %s5293_s7, %s5293_s7, %s5294_s8  }
 0x64b   :  { %5290 = dma.done.wait [#allocation4], 256  }
 0x64c   :  { %5291 = vsyncadd [#allocation4], 4294967040 }
 0x64d   :  { %4538 = vsyncpa [#allocation3], 1 }
 0x64e   :  { %4539 = vsyncpa [#allocation4], 1 }

</bundles_post_ra>
